<compile_context>
chip_gen: v7x
topology: tpu7x:2x2x1
jax: 0.10.0
libtpu: 0.0.40
codegen_flags: <defaults>
</compile_context>

<pallas_src>
import jax
import jax.numpy as jnp
from jax.experimental import pallas as pl
from jax.experimental.pallas import tpu as pltpu

_HIGHEST = jax.lax.Precision.HIGHEST


def _graph_attention_kernel(ids_ref, lc_ref, la_ref, w_ref, edge_hbm,
                            out_ref, edge_buf, sem):
    # ids_ref  : SMEM (n_pad,) int32  flattened concept ids (scalar prefetch)
    # lc_ref   : VMEM (1, V)  f32     lambda * |cos| * concentration_factor
    # la_ref   : VMEM (1, V)  f32     (1 - lambda) * affectiveness * factor
    # w_ref    : VMEM (V, E)  bf16    concept_embed.weight
    # edge_hbm : HBM  (V, V)  f32     normalized edge matrix (memory_space=ANY)
    # out_ref  : VMEM (TN, E) f32     softmax(edge*lc + (edge>0)*la) @ W
    # edge_buf : VMEM (TN, V) f32     scratch for the gathered edge rows
    # sem      : single DMA semaphore shared by all row-gather copies
    tile_n, _v = edge_buf.shape
    base = pl.program_id(0) * tile_n

    # Gather this tile's edge-matrix rows straight from HBM (row ids live in
    # SMEM via scalar prefetch).  Start all row DMAs, then wait on all of them.
    # Every copy signals the same semaphore with an identical byte count, so
    # tile_n waits of that size guarantee completion of every row.
    @pl.loop(0, tile_n)
    def _start(r):
        row = ids_ref[base + r]
        pltpu.make_async_copy(edge_hbm.at[pl.ds(row, 1), :],
                              edge_buf.at[pl.ds(r, 1), :],
                              sem).start()

    @pl.loop(0, tile_n)
    def _wait(r):
        pltpu.make_async_copy(edge_hbm.at[pl.ds(0, 1), :],
                              edge_buf.at[pl.ds(r, 1), :],
                              sem).wait()

    edge = edge_buf[...]                                     # (TN, V) f32
    lc = lc_ref[...]                                         # (1, V)
    la = la_ref[...]                                         # (1, V)

    # Folded elementwise math: 1 mul + 1 cmp + 1 select + 1 add per element.
    logits = edge * lc + jnp.where(edge > 0.0, la, 0.0)      # (TN, V)

    m = jnp.max(logits, axis=-1, keepdims=True)
    p = jnp.exp(logits - m)
    denom = jnp.sum(p, axis=-1, keepdims=True)
    p = p * pl.reciprocal(denom, approx=True)                # softmax over V

    # Single-pass bf16 MXU matmul, f32 accumulation.
    out_ref[...] = jnp.dot(p.astype(jnp.bfloat16), w_ref[...],
                           preferred_element_type=jnp.float32)


def _choose_tile_n(n, v, e, budget_bytes=24 << 20):
    # Largest row tile (multiple of 8, capped at 512) such that the per-step
    # blocks -- f32 edge-row scratch + double-buffered f32 output rows -- fit
    # the VMEM budget.  Small problems run in a single grid step.
    per_row = 4 * v + 2 * 4 * e
    t = max(8, min(512, (budget_bytes // per_row) // 8 * 8))
    n_pad8 = -(-n // 8) * 8
    return int(min(t, n_pad8))


def graph_attention_core(ids, lc, la, concept_w_bf16, edge_matrix, *, tile_n):
    n_pad = ids.shape[0]
    v, e = concept_w_bf16.shape
    assert n_pad % tile_n == 0

    # VMEM budget: resident concept table + lc/la + double-buffered out block
    # + edge-row scratch.  Grid-invariant blocks keep a constant index_map, so
    # Pallas never re-DMAs them between steps.
    vmem_need = (2 * v * e * 2 + 2 * 2 * v * 4
                 + 2 * tile_n * e * 4 + tile_n * v * 4)
    vmem_limit = int(min(max(2 * vmem_need, 32 * 1024 * 1024),
                         64 * 1024 * 1024))

    return pl.pallas_call(
        _graph_attention_kernel,
        out_shape=jax.ShapeDtypeStruct((n_pad, e), jnp.float32),
        grid_spec=pltpu.PrefetchScalarGridSpec(
            num_scalar_prefetch=1,                 # flattened concept ids -> SMEM
            grid=(n_pad // tile_n,),
            in_specs=[
                pl.BlockSpec((1, v), lambda i, _ids: (0, 0)),   # lc (invariant)
                pl.BlockSpec((1, v), lambda i, _ids: (0, 0)),   # la (invariant)
                pl.BlockSpec((v, e), lambda i, _ids: (0, 0)),   # concept table
                pl.BlockSpec(memory_space=pl.ANY),              # edge matrix in HBM
            ],
            out_specs=pl.BlockSpec((tile_n, e), lambda i, _ids: (i, 0)),
            scratch_shapes=[
                pltpu.VMEM((tile_n, v), jnp.float32),           # gathered edge rows
                pltpu.SemaphoreType.DMA(()),                    # one sem for all rows
            ],
        ),
        compiler_params=pltpu.CompilerParams(
            dimension_semantics=("parallel",),      # no cross-step state -> shardable
            vmem_limit_bytes=vmem_limit,
        ),
    )(ids, lc, la, concept_w_bf16, edge_matrix)


def _masked_mean(x, lengths):
    # x: (B, L, E), lengths: (B,) int; per-example mean over first lengths[i]
    # rows, zeros (empty_tensor) when length == 0.
    B, L, _ = x.shape
    mask = (jnp.arange(L)[None, :] < lengths[:, None]).astype(jnp.float32)
    denom = jnp.maximum(lengths.astype(jnp.float32), 1.0)[:, None]
    out = jnp.sum(x * mask[..., None], axis=1) / denom
    return jnp.where((lengths > 0)[:, None], out, 0.0)


def graph_attention_forward(params, concepts_list, concepts_length):
    embed_w = params["embed"].astype(jnp.float32)            # (V, E)
    concept_w = params["concept_embed"].astype(jnp.float32)  # (V, E)
    edge_matrix = params["edge_matrix"].astype(jnp.float32)  # (V, V) normalized
    aff = params["affectiveness"].astype(jnp.float32)        # (V,)
    lam = params["lambda"].astype(jnp.float32)               # (V,)
    factor = jnp.float32(params["concentration_factor"])

    B, L = concepts_list.shape
    V, E = concept_w.shape

    # --- get_context_representation (glue, O(B*L*E)) -------------------------
    concepts_embed = embed_w[concepts_list]                       # (B, L, E)
    per_example = _masked_mean(concepts_embed, concepts_length)   # (B, E)
    context_rep = jnp.mean(per_example, axis=0)                   # (E,)

    # --- hoisted cosine + folded per-vocab scalars (O(V*E) one-off) ----------
    dots = jnp.einsum("ve,e->v", concept_w, context_rep, precision=_HIGHEST)
    denom = jnp.maximum(jnp.linalg.norm(context_rep) *
                        jnp.linalg.norm(concept_w, axis=1), 1e-8)
    cos = jnp.abs(dots / denom)                                   # (V,)
    lc = (lam * cos * factor)[None, :]                            # (1, V)
    la = ((1.0 - lam) * aff * factor)[None, :]                    # (1, V)

    # --- flattened / padded concept ids for the in-kernel row gather ---------
    n = B * L
    tile_n = _choose_tile_n(n, V, E)
    n_pad = -(-n // tile_n) * tile_n
    ids = jnp.zeros((n_pad,), jnp.int32).at[:n].set(
        concepts_list.reshape(-1).astype(jnp.int32))

    core = graph_attention_core(ids, lc, la,
                                concept_w.astype(jnp.bfloat16),
                                edge_matrix, tile_n=tile_n)       # (n_pad, E)
    core = core[:n].reshape(B, L, E)

    return _masked_mean(core, concepts_length)                    # (B, E)


def reference_forward(params, concepts_list, concepts_length):
    # Pure-JAX f32 reference mirroring the PyTorch forward.
    embed_w = params["embed"]
    concept_w = params["concept_embed"]
    edge_matrix = params["edge_matrix"]
    aff = params["affectiveness"]
    lam = params["lambda"]
    factor = params["concentration_factor"]

    concepts_embed = embed_w[concepts_list]
    per_example = _masked_mean(concepts_embed, concepts_length)
    context_rep = jnp.mean(per_example, axis=0)                   # (E,)

    dots = jnp.einsum("e,ve->v", context_rep, concept_w, precision=_HIGHEST)
    denom = jnp.maximum(jnp.linalg.norm(context_rep) *
                        jnp.linalg.norm(concept_w, axis=1), 1e-8)
    cos = jnp.abs(dots / denom)                                   # (V,)

    edge_g = edge_matrix[concepts_list]                           # (B, L, V)
    rel = edge_g * cos
    a = (edge_g > 0).astype(jnp.float32) * aff
    wgt = lam * rel + (1 - lam) * a
    probs = jax.nn.softmax(wgt * factor, axis=2)
    emb = jnp.einsum("blv,ve->ble", probs, concept_w, precision=_HIGHEST)
    return _masked_mean(emb, concepts_length)


if __name__ == "__main__":
    V, E = 256, 128      # vocab_size, embedding_dim
    B, L = 2, 8          # batch, concepts per example
    GAW = 0.5            # graph_attention_weight (>= 0 -> used as lambda fill)
    CONC = 2.0           # concentrator_factor

    key = jax.random.PRNGKey(0)
    k1, k2, k3, k4, k5 = jax.random.split(key, 5)

    embed_w = 0.1 * jax.random.normal(k1, (V, E), jnp.float32)
    concept_w = 0.1 * jax.random.normal(k2, (V, E), jnp.float32)
    raw_edge = jax.random.uniform(k3, (V, V), jnp.float32)
    # init_params edge-matrix normalization
    rng = (raw_edge.max(axis=1) - raw_edge.min(axis=0))[:, None]
    edge_matrix = raw_edge / (rng + (rng == 0).astype(jnp.float32))
    affectiveness = jax.random.uniform(k4, (V,), jnp.float32)
    lam = jnp.full((V,), GAW, jnp.float32)

    concepts_list = jax.random.randint(k5, (B, L), 0, V, dtype=jnp.int32)
    concepts_length = jnp.array([6, 0], dtype=jnp.int32)   # exercises empty_tensor path

    params = dict(embed=embed_w, concept_embed=concept_w, edge_matrix=edge_matrix,
                  affectiveness=affectiveness, **{"lambda": lam},
                  concentration_factor=CONC)

    out = graph_attention_forward(params, concepts_list, concepts_length)
    out = jax.block_until_ready(out)
    assert out.shape == (B, E) and out.dtype == jnp.float32

    ref = jax.block_until_ready(
        reference_forward(params, concepts_list, concepts_length))
    # Kernel uses bf16 MXU inputs + approx reciprocal -> relaxed tolerance vs f32 ref.
    assert jnp.allclose(out, ref, rtol=2e-2, atol=1e-3), \
        f"max abs diff {float(jnp.max(jnp.abs(out - ref)))}"

    print("KERNEL_OK")
</pallas_src>

<mosaic_0001>
module attributes {stable_mosaic.version = 11 : i64} {
  func.func @_graph_attention_kernel(%arg0: i32, %arg1: memref<16xi32, #tpu.memory_space<smem>>, %arg2: memref<1x256xf32, #tpu.memory_space<vmem>>, %arg3: memref<1x256xf32, #tpu.memory_space<vmem>>, %arg4: memref<256x128xbf16, #tpu.memory_space<vmem>>, %arg5: memref<256x256xf32, #tpu.memory_space<any>>, %arg6: memref<16x128xf32, #tpu.memory_space<vmem>>, %arg7: memref<16x256xf32, #tpu.memory_space<vmem>>, %arg8: memref<!tpu.dma_semaphore, #tpu.memory_space<semaphore_mem>>) attributes {dimension_semantics = [#tpu.dimension_semantics<parallel>], iteration_bounds = array<i64: 1>, scalar_prefetch = 1 : i64, scratch_operands = 2 : i64, tpu.core_type = #tpu.core_type<tc>, window_params = [{pipeline_mode = #tpu.pipeline_mode<synchronous>, transform_indices = @transform_0, window_bounds = array<i64: 1, 256>}, {pipeline_mode = #tpu.pipeline_mode<synchronous>, transform_indices = @transform_1, window_bounds = array<i64: 1, 256>}, {pipeline_mode = #tpu.pipeline_mode<synchronous>, transform_indices = @transform_2, window_bounds = array<i64: 256, 128>}, {}, {transform_indices = @transform_4, window_bounds = array<i64: 16, 128>}]} {
    %c16_i32 = arith.constant 16 : i32
    %0 = arith.muli %arg0, %c16_i32 : i32
    %c0_i32 = arith.constant 0 : i32
    %c16_i32_0 = arith.constant 16 : i32
    %1 = arith.addi %c0_i32, %c16_i32_0 : i32
    %c1_i32 = arith.constant 1 : i32
    scf.for %arg9 = %c0_i32 to %1 step %c1_i32  : i32 {
      %c1_i32_19 = arith.constant 1 : i32
      %29 = arith.muli %arg9, %c1_i32_19 : i32
      %c0_i32_20 = arith.constant 0 : i32
      %30 = arith.addi %c0_i32_20, %29 : i32
      %31 = arith.addi %0, %30 : i32
      %32 = arith.index_cast %31 : i32 to index
      %33 = memref.load %arg1[%32] : memref<16xi32, #tpu.memory_space<smem>>
      %c0_i32_21 = arith.constant 0 : i32
      %34 = tpu.memref_slice %arg5[%33, %c0_i32_21] : memref<256x256xf32, #tpu.memory_space<any>> -> memref<1x256xf32, #tpu.memory_space<any>>
      %c0_i32_22 = arith.constant 0 : i32
      %35 = tpu.memref_slice %arg7[%30, %c0_i32_22] : memref<16x256xf32, #tpu.memory_space<vmem>> -> memref<1x256xf32, #tpu.memory_space<vmem>>
      tpu.enqueue_dma source(%34 : memref<1x256xf32, #tpu.memory_space<any>>) target(%35 : memref<1x256xf32, #tpu.memory_space<vmem>>) target_semaphore(%arg8 : memref<!tpu.dma_semaphore, #tpu.memory_space<semaphore_mem>>)
    }
    %c16_i32_1 = arith.constant 16 : i32
    %c0_i32_2 = arith.constant 0 : i32
    %c16_i32_3 = arith.constant 16 : i32
    %2 = arith.addi %c0_i32_2, %c16_i32_3 : i32
    %c1_i32_4 = arith.constant 1 : i32
    scf.for %arg9 = %c0_i32_2 to %2 step %c1_i32_4  : i32 {
      %c1_i32_19 = arith.constant 1 : i32
      %29 = arith.muli %arg9, %c1_i32_19 : i32
      %c0_i32_20 = arith.constant 0 : i32
      %30 = arith.addi %c0_i32_20, %29 : i32
      %c0_i32_21 = arith.constant 0 : i32
      %c0_i32_22 = arith.constant 0 : i32
      %31 = tpu.memref_slice %arg5[%c0_i32_21, %c0_i32_22] : memref<256x256xf32, #tpu.memory_space<any>> -> memref<1x256xf32, #tpu.memory_space<any>>
      %c0_i32_23 = arith.constant 0 : i32
      %32 = tpu.memref_slice %arg7[%30, %c0_i32_23] : memref<16x256xf32, #tpu.memory_space<vmem>> -> memref<1x256xf32, #tpu.memory_space<vmem>>
      tpu.wait_dma2 semaphore(%arg8 : memref<!tpu.dma_semaphore, #tpu.memory_space<semaphore_mem>>) src(%31 : memref<1x256xf32, #tpu.memory_space<any>>) dst(%32 : memref<1x256xf32, #tpu.memory_space<vmem>>)
    }
    %c16_i32_5 = arith.constant 16 : i32
    %c0 = arith.constant 0 : index
    %c0_6 = arith.constant 0 : index
    %3 = vector.load %arg7[%c0, %c0_6] : memref<16x256xf32, #tpu.memory_space<vmem>>, vector<16x256xf32>
    %c0_7 = arith.constant 0 : index
    %c0_8 = arith.constant 0 : index
    %4 = vector.load %arg2[%c0_7, %c0_8] : memref<1x256xf32, #tpu.memory_space<vmem>>, vector<1x256xf32>
    %c0_9 = arith.constant 0 : index
    %c0_10 = arith.constant 0 : index
    %5 = vector.load %arg3[%c0_9, %c0_10] : memref<1x256xf32, #tpu.memory_space<vmem>>, vector<1x256xf32>
    %6 = vector.broadcast %4 : vector<1x256xf32> to vector<16x256xf32>
    %7 = arith.mulf %3, %6 : vector<16x256xf32>
    %cst = arith.constant 0.000000e+00 : f32
    %8 = vector.broadcast %cst : f32 to vector<16x256xf32>
    %9 = arith.cmpf ogt, %3, %8 : vector<16x256xf32>
    %cst_11 = arith.constant 0.000000e+00 : f32
    %10 = vector.shape_cast %5 : vector<1x256xf32> to vector<1x256xf32>
    %11 = vector.broadcast %10 : vector<1x256xf32> to vector<16x256xf32>
    %12 = vector.broadcast %cst_11 : f32 to vector<16x256xf32>
    %13 = arith.select %9, %11, %12 : vector<16x256xi1>, vector<16x256xf32>
    %14 = arith.addf %7, %13 : vector<16x256xf32>
    %cst_12 = arith.constant dense<0xFF800000> : vector<16xf32>
    %15 = vector.multi_reduction <maximumf>, %14, %cst_12 [1] : vector<16x256xf32> to vector<16xf32>
    %16 = vector.shape_cast %15 : vector<16xf32> to vector<16x1xf32>
    %17 = vector.broadcast %16 : vector<16x1xf32> to vector<16x256xf32>
    %18 = arith.subf %14, %17 : vector<16x256xf32>
    %19 = math.exp %18 : vector<16x256xf32>
    %cst_13 = arith.constant dense<0.000000e+00> : vector<16xf32>
    %20 = vector.multi_reduction <add>, %19, %cst_13 [1] : vector<16x256xf32> to vector<16xf32>
    %21 = vector.shape_cast %20 : vector<16xf32> to vector<16x1xf32>
    %22 = tpu.reciprocal %21 {approx = true} : vector<16x1xf32> -> vector<16x1xf32>
    %23 = vector.broadcast %22 : vector<16x1xf32> to vector<16x256xf32>
    %24 = arith.mulf %19, %23 : vector<16x256xf32>
    %25 = arith.truncf %24 : vector<16x256xf32> to vector<16x256xbf16>
    %c0_14 = arith.constant 0 : index
    %c0_15 = arith.constant 0 : index
    %26 = vector.load %arg4[%c0_14, %c0_15] : memref<256x128xbf16, #tpu.memory_space<vmem>>, vector<256x128xbf16>
    %cst_16 = arith.constant dense<0.000000e+00> : vector<16x128xf32>
    %27 = tpu.matmul %25, %26, %cst_16 {dimension_numbers = #tpu.dot_dimension_numbers<[1], [0], [0], [1], [0, 0, 1, 1], [], []>} : vector<16x256xbf16>, vector<256x128xbf16>, vector<16x128xf32> -> vector<16x128xf32>
    %c0_17 = arith.constant 0 : index
    %c0_18 = arith.constant 0 : index
    %28 = vector.load %arg6[%c0_17, %c0_18] : memref<16x128xf32, #tpu.memory_space<vmem>>, vector<16x128xf32>
    tpu.vector_store %arg6[%c0_17, %c0_18], %27 {strides = array<i32>} : memref<16x128xf32, #tpu.memory_space<vmem>>, vector<16x128xf32>,
    return
  }
  func.func @transform_0(%arg0: i32, %arg1: memref<16xi32, #tpu.memory_space<smem>>) -> (i32, i32) {
    %c0_i32 = arith.constant 0 : i32
    %c0_i32_0 = arith.constant 0 : i32
    %c0_i32_1 = arith.constant 0 : i32
    return %c0_i32, %c0_i32_0 : i32, i32
  }
  func.func @transform_1(%arg0: i32, %arg1: memref<16xi32, #tpu.memory_space<smem>>) -> (i32, i32) {
    %c0_i32 = arith.constant 0 : i32
    %c0_i32_0 = arith.constant 0 : i32
    %c0_i32_1 = arith.constant 0 : i32
    return %c0_i32, %c0_i32_0 : i32, i32
  }
  func.func @transform_2(%arg0: i32, %arg1: memref<16xi32, #tpu.memory_space<smem>>) -> (i32, i32) {
    %c0_i32 = arith.constant 0 : i32
    %c0_i32_0 = arith.constant 0 : i32
    %c0_i32_1 = arith.constant 0 : i32
    return %c0_i32, %c0_i32_0 : i32, i32
  }
  func.func @transform_4(%arg0: i32, %arg1: memref<16xi32, #tpu.memory_space<smem>>) -> (i32, i32) {
    %c0_i32 = arith.constant 0 : i32
    %c0_i32_0 = arith.constant 0 : i32
    return %arg0, %c0_i32 : i32, i32
  }
}

</mosaic_0001>

<bundles_post_ra>
// kernel: tpu_custom_call.1
= control target key start
LH: loop header
LB: loop body
LE: loop exit
PB: predicated region body
PF: predicated region fallthrough
CT: control target
= control target key end

     0   :  { %s662_s0 = inlined_call_operand.hbm [shape: s32[16], index: 0, kind: input, shape index: {}]   ;;  %s663_s1 = inlined_call_operand.vmem [shape: f32[1,256], index: 1, kind: input, shape index: {}]   ;;  %s664_s2 = inlined_call_operand.vmem [shape: f32[1,256], index: 2, kind: input, shape index: {}]   ;;  %s665_s3 = inlined_call_operand.hbm [shape: bf16[256,128], index: 3, kind: input, shape index: {}]   ;;  %s666_s4 = inlined_call_operand.hbm [shape: f32[256,256], index: 4, kind: input, shape index: {}]   ;;  %s667_s5 = inlined_call_operand.hbm [shape: f32[16,128], index: 5, kind: output, shape index: {}]  }
   0x1   :  { %s452_s20 = scalar_lea.hbm %s662_s0, 16 }
   0x2   :  { %p453_p0 = scmp.ne.s32.totalorder %s662_s0, %s452_s20  ;;  %p456_p1 = scmp.lt.u32.totalorder %s452_s20, %s662_s0 }
   0x4   :  { %p458_p2 = pnand %p456_p1, %p453_p0 }
   0x6   :  { %461 = shalt.err (!%p458_p2)  }
   0x7   :  { %s554_s25 = smov [#allocation5]  }
   0x8   :  { %11 = dma.hbm_to_smem %s662_s0, 16, %s554_s25, [#allocation4] }
   0x9   :  { %538 = dma.done.wait [#allocation4], 16 }
   0xa   :  { %539 = vsyncadd [#allocation4], 4294967280 }
   0xb   :  { %13 = sfence }
   0xc   :  { %14 = vsyncpa [#allocation7], 0 }
   0xd   :  { %15 = vsyncpa [#allocation8], 0  ;;  %s555_s28 = smov [#allocation6]   ;;  %s462_s7 = scalar_lea.hbm %s665_s3, 2048 }
   0xe   :  { %s25_s29 = sshll.u32 %s555_s28, 4  ;;  %p463_p3 = scmp.ne.s32.totalorder %s665_s3, %s462_s7  ;;  %s26_s29 = int_to_ptr.vmem [resolvable:$true] %s25_s29 }
   0xf   :  { %p466_p4 = scmp.lt.u32.totalorder %s462_s7, %s665_s3 }
  0x11   :  { %p468_p5 = pnand %p466_p4, %p463_p3 }
  0x13   :  { %471 = shalt.err (!%p468_p5)
}
  0x14   :  { %s472_s0 = scalar_lea.vmem %s26_s29, 2048  ;;  %p477_p7 = scmp.lt.s32.totalorder %s26_s29, %s26_s29 }
  0x15   :  { %p473_p6 = scmp.ne.s32.totalorder %s26_s29, %s472_s0  ;;  %p478_p8 = scmp.lt.s32.totalorder %s472_s0, %s472_s0 }
  0x17   :  { %p479_p9 = por %p478_p8, %p477_p7 }
  0x19   :  { %p480_p10 = pnand %p479_p9, %p473_p6 }
  0x1b   :  { %483 = shalt.err (!%p480_p10)
}
  0x1c   :  { %s556_s12 = smov 64   ;;  %s557_s13 = smov 4  }
  0x1d   :  { %31 = dma.hbm_to_vmem [thread:$0]  %s665_s3, 2048, %s26_s29, [#allocation7], %s556_s12, %s556_s12, %s557_s13  }
  0x1e   :  { %540 = dma.done.wait [#allocation7], 2048  }
  0x1f   :  { %541 = vsyncadd [#allocation7], 4294965248  ;;  %s618_s16 = smov 0  }
  0x20 LB: > { %s44_s17 = sld [smem:[#allocation5 + %s548_s16]]  ;;  %s51_s18 = sshrl.u32 %s548_s16, 3  ;;  %s548_s16 = sphi %s618_s16, %s42_s16  }
  0x21   : > { %s52_s19 = sand.u32 7, %s548_s16   ;;  %s359_s20 = sshll.u32 %s51_s18, 4 }
  0x22   : > { %s54_s21 = sadd.s32 %s359_s20, %s52_s19  ;;  %s486_s9 = scalar_lea.hbm %s666_s4, 8192 }
  0x23   : > { %s55_s22 = scalar_lea.vmem [#allocation2], %s54_s21 }
  0x24   : > { %s57_s23 = sshll.u32 %s55_s22, 4  ;;  %s626_s23 = int_to_ptr.vmem [resolvable:$true] %s57_s23 }
  0x26   : > { %s45_s3 = sshrl.u32 %s44_s17, 3  ;;  %s46_s24 = sand.u32 7, %s44_s17  }
  0x27   : > { %s357_s25 = sshll.u32 %s45_s3, 4 }
  0x28   : > { %s48_s26 = sadd.s32 %s357_s25, %s46_s24 }
  0x29   : > { %s358_s27 = sshll.u32 %s48_s26, 4 }
  0x2a   : > { %s50_s30 = scalar_lea.hbm %s666_s4, %s358_s27 }
  0x2b   : > { %s484_s6 = scalar_lea.hbm %s50_s30, 32  ;;  %p487_p12 = scmp.lt.u32.totalorder %s50_s30, %s666_s4 }
  0x2c   : > { %p485_p11 = scmp.ne.s32.totalorder %s50_s30, %s484_s6  ;;  %p488_p13 = scmp.lt.u32.totalorder %s486_s9, %s484_s6 }
  0x2d   : > { %p490_p1 = scmp.lt.u32.totalorder %s484_s6, %s50_s30 }
  0x2e   : > { %p489_p0 = por %p488_p13, %p487_p12 }
  0x30   : > { %p491_p2 = por %p490_p1, %p489_p0 }
  0x32   : > { %p492_p3 = pnand %p491_p2, %p485_p11 }
  0x34   : > { %495 = shalt.err (!%p492_p3)  }
  0x35   : > { %s496_s0 = scalar_lea.vmem %s626_s23, 32  ;;  %s558_s12 = smov [#allocation2]  }
  0x36   : > { %p497_p4 = scmp.ne.s32.totalorder %s626_s23, %s496_s0  ;;  %s498_s13 = sshll.u32 %s558_s12, 4  ;;  %s499_s13 = int_to_ptr.vmem [resolvable:$false] %s498_s13 }
  0x37   : > { %s500_s14 = scalar_lea.vmem %s499_s13, 512  ;;  %p501_p5 = scmp.lt.s32.totalorder %s626_s23, %s499_s13 }
  0x38   : > { %p502_p6 = scmp.lt.s32.totalorder %s500_s14, %s496_s0 }
  0x3a   : > { %p503_p7 = por %p502_p6, %p501_p5 }
  0x3c   : > { %p504_p8 = pnand %p503_p7, %p497_p4 }
  0x3e   : > { %507 = shalt.err (!%p504_p8)  }
  0x3f   : > { %s559_s15 = smov 128   ;;  %s560_s17 = smov 1  }
  0x40   : > { %60 = dma.hbm_to_vmem [thread:$0]  %s50_s30, 32, %s626_s23, [#allocation3], %s559_s15, %s559_s15, %s560_s17 }
  0x41   : > { %s42_s16 = sadd.s32 1, %s548_s16  }
  0x42   : > { %p39_p9 = scmp.ge.s32.totalorder %s42_s16, 16  }
  0x43   :  { %s550_s18 = smov (%p39_p9), 0  }
  0x44   :  { %41 = sbr.rel (!%p39_p9) target bundleno = 32 (0x20), region = 52 }
  0x4b LB: > { %542 = dma.done.wait [#allocation3], 32  ;;  %s552_s18 = sphi %s550_s18, %s66_s18  }
  0x4c   : > { %543 = vsyncadd [#allocation3], 4294967264  ;;  %s66_s18 = sadd.s32 1, %s552_s18  }
  0x4d   : > { %p63_p10 = scmp.ge.s32.totalorder %s66_s18, 16  }
  0x4e   :  { %v70_v0 = vld [vmem:[#allocation2] sm:$0xff] (%p63_p10)  ;;  %v71_v1 = vld [vmem:[#allocation2 + $0x8] sm:$0xff] (%p63_p10)  ;;  %v77_v2 = vlaneseq (%p63_p10)  ;;  %v74_v3 = vld [vmem:[%s663_s1] sm:$0x3] (%p63_p10)  ;;  %s561_s1 = smov (%p63_p10), [#allocation9]  }
  0x4f   :  { %65 = sbr.rel (!%p63_p10) target bundleno = 75 (0x4b), region = 63  ;;  %v75_v4 = vld [vmem:[%s664_s2] sm:$0x3] (%p63_p10)  ;;  %vm91_vm0 = vcmp.gt.f32.partialorder (%p63_p10), %v70_v0, 0.0  ;;  %v73_v6 = vld [vmem:[#allocation2 + $0x18] sm:$0xff] (%p63_p10)  ;;  %vm92_vm1 = vcmp.gt.f32.partialorder (%p63_p10), %v71_v1, 0.0 }
  0x50   :  { %v72_v5 = vld [vmem:[#allocation2 + $0x10] sm:$0xff] (%p63_p10)  ;;  %v78_v7 = vshrl.u32 (%p63_p10), %v77_v2, 7  ;;  %vm94_vm3 = vcmp.gt.f32.partialorder (%p63_p10), %v73_v6, 0.0  ;;  %v424_v28 = vld [vmem:[#allocation6 + $0x40] sm:$0xff] (%p63_p10)   ;;  %v426_v30 = vld [vmem:[#allocation6 + $0x48] sm:$0xff] (%p63_p10)   ;;  %s322_s2 = sshll.u32 (%p63_p10), %s561_s1, 4  ;;  %s323_s2 = int_to_ptr.vmem [resolvable:$true] %s322_s2 }
  0x51   :  { %vm93_vm2 = vcmp.gt.f32.partialorder (%p63_p10), %v72_v5, 0.0  ;;  %v425_v29 = vld [vmem:[#allocation6] sm:$0xff] (%p63_p10)   ;;  %377 = vmatprep.subr.bf16.mxu0 (%p63_p10), %v424_v28  ;;  %v427_v31 = vld [vmem:[#allocation6 + $0x8] sm:$0xff] (%p63_p10)   ;;  %v428_v32 = vld [vmem:[#allocation6 + $0x50] sm:$0xff] (%p63_p10)   ;;  %s508_s4 = scalar_lea.vmem (%p63_p10), %s323_s2, 256  ;;  %p513_p12 = scmp.lt.s32.totalorder (%p63_p10), %s323_s2, %s323_s2 }
  0x52   :  { %v79_v8 = vsub.s32 (%p63_p10), 0, %v78_v7  ;;  %v83_v9 = vsub.s32 (%p63_p10), 1, %v78_v7  ;;  %378 = vmatpush3.bf16.msra.mxu0 (%p63_p10), %v425_v29  ;;  %v429_v33 = vld [vmem:[#allocation6 + $0x10] sm:$0xff] (%p63_p10)   ;;  %v430_v50 = vld [vmem:[#allocation6 + $0x58] sm:$0xff] (%p63_p10)   ;;  %v432_v52 = vld [vmem:[#allocation6 + $0x60] sm:$0xff] (%p63_p10)   ;;  %p509_p11 = scmp.ne.s32.totalorder (%p63_p10), %s323_s2, %s508_s4  ;;  %p514_p13 = scmp.lt.s32.totalorder (%p63_p10), %s508_s4, %s508_s4 }
  0x53   :  { %379 = vmatprep.subr.bf16.mxu0 (%p63_p10), %v426_v30  ;;  %v431_v51 = vld [vmem:[#allocation6 + $0x18] sm:$0xff] (%p63_p10)   ;;  %v433_v53 = vld [vmem:[#allocation6 + $0x20] sm:$0xff] (%p63_p10)   ;;  %v434_v54 = vld [vmem:[#allocation6 + $0x68] sm:$0xff] (%p63_p10)  }
  0x54   :  { %v80_v10 = vrot.slane (%p63_p10), %v74_v3, %v79_v8  ;;  %v84_v11 = vrot.slane (%p63_p10), %v74_v3, %v83_v9  ;;  %v99_v12 = vrot.slane (%p63_p10), %v75_v4, %v79_v8  ;;  %v103_v13 = vrot.slane (%p63_p10), %v75_v4, %v83_v9  ;;  %v435_v55 = vld [vmem:[#allocation6 + $0x28] sm:$0xff] (%p63_p10)   ;;  %v436_v56 = vld [vmem:[#allocation6 + $0x70] sm:$0xff] (%p63_p10)   ;;  %v438_v58 = vld [vmem:[#allocation6 + $0x78] sm:$0xff] (%p63_p10)   ;;  %p515_p0 = por (%p63_p10), %p514_p13, %p513_p12 }
  0x55   :  { %v437_v57 = vld [vmem:[#allocation6 + $0x30] sm:$0xff] (%p63_p10)   ;;  %v439_v59 = vld [vmem:[#allocation6 + $0x38] sm:$0xff] (%p63_p10)  }
  0x56   :  { %v87_v14 = vmul.f32 %v80_v10, %v70_v0  ;;  %v88_v15 = vmul.f32 %v84_v11, %v71_v1  ;;  %v106_v16 = vsel %vm91_vm0, %v99_v12, 0.0  ;;  %v107_v17 = vsel %vm92_vm1, %v103_v13, 0.0  ;;  %380 = vmatpush3.bf16.msra.mxu0 %v427_v31  ;;  %p516_p1 = pnand %p515_p0, %p509_p11 }
  0x57   :  { %v89_v18 = vmul.f32 %v80_v10, %v72_v5  ;;  %v90_v19 = vmul.f32 %v84_v11, %v73_v6  ;;  %v108_v20 = vsel %vm93_vm2, %v99_v12, 0.0  ;;  %v109_v21 = vsel %vm94_vm3, %v103_v13, 0.0  ;;  %381 = vmatprep.subr.bf16.mxu0 %v428_v32 }
  0x58   :  { %v110_v22 = vadd.f32 %v106_v16, %v87_v14  ;;  %v111_v23 = vadd.f32 %v107_v17, %v88_v15 }
  0x59   :  { %v112_v24 = vadd.f32 %v108_v20, %v89_v18  ;;  %v113_v25 = vadd.f32 %v109_v21, %v90_v19 }
  0x5a   :  { %v114_v26 = vmax.f32 %v110_v22, %v111_v23  ;;  %382 = vmatpush3.bf16.msra.mxu0 %v429_v33 }
  0x5b   :  { %v117_v27 = vmax.f32 %v112_v24, %v113_v25  ;;  %383 = vmatprep.subr.bf16.mxu0 %v430_v50 }
  0x5c   :  { %115 = vmax.xlane.f32.xlu0 %v114_v26 }
  0x5e   :  { %384 = vmatpush3.bf16.msra.mxu0 %v431_v51 }
  0x5f   :  { %385 = vmatprep.subr.bf16.mxu0 %v432_v52 }
  0x60   :  { %118 = vmax.xlane.f32.xlu0 %v117_v27 }
  0x62   :  { %386 = vmatpush3.bf16.msra.mxu0 %v433_v53 }
  0x63   :  { %387 = vmatprep.subr.bf16.mxu0 %v434_v54 }
  0x66   :  { %388 = vmatpush3.bf16.msra.mxu0 %v435_v55 }
  0x67   :  { %389 = vmatprep.subr.bf16.mxu0 %v436_v56 }
  0x6a   :  { %390 = vmatpush3.bf16.msra.mxu0 %v437_v57 }
  0x6b   :  { %391 = vmatprep.subr.bf16.mxu0 %v438_v58 }
  0x6e   :  { %392 = vmatpush3.bf16.msra.mxu0 %v439_v59 }
  0xe9   :  { %v116_v34 = vpop.xlane.xlu0 %115 }
  0xea   :  { %v120_v35 = vsub.f32 %v110_v22, %v116_v34  ;;  %v121_v36 = vsub.f32 %v111_v23, %v116_v34 }
  0xec   :  { %v124_v37 = vmul.f32 1.442695, %v120_v35  ;;  %v126_v38 = vmul.f32 1.442695, %v121_v36 }
  0xed   :  { %v119_v39 = vpop.xlane.xlu0 %118 }
  0xee   :  { %440 = vpow2.f32 %v124_v37  ;;  %v122_v40 = vsub.f32 %v112_v24, %v119_v39  ;;  %v123_v41 = vsub.f32 %v113_v25, %v119_v39 }
  0xef   :  { %442 = vpow2.f32 %v126_v38 }
  0xf0   :  { %v128_v42 = vmul.f32 1.442695, %v122_v40  ;;  %v130_v43 = vmul.f32 1.442695, %v123_v41 }
  0xf2   :  { %444 = vpow2.f32 %v128_v42 }
  0xf3   :  { %446 = vpow2.f32 %v130_v43 }
  0xf8   :  { %v441_v44 = vpop.eup %440 }
  0xf9   :  { %v443_v45 = vpop.eup %442 }
  0xfa   :  { %v132_v46 = vadd.f32 %v443_v45, %v441_v44 }
  0xfc   :  { %v445_v47 = vpop.eup %444  ;;  %133 = vadd.xlane.f32.xlu1 %v132_v46 }
  0xfd   :  { %v447_v48 = vpop.eup %446 }
  0xfe   :  { %v135_v49 = vadd.f32 %v447_v48, %v445_v47 }
 0x100   :  { %136 = vadd.xlane.f32.xlu1 %v135_v49 }
 0x189   :  { %v134_v60 = vpop.xlane.xlu1 %133 }
 0x18a   :  { %448 = vrcp.f32 %v134_v60 }
 0x18d   :  { %v137_v61 = vpop.xlane.xlu1 %136 }
 0x18e   :  { %450 = vrcp.f32 %v137_v61 }
 0x194   :  { %v449_v62 = vpop.eup %448 }
 0x195   :  { %v141_v0 = vmul.f32 %v449_v62, %v443_v45  ;;  %v140_v2 = vmul.f32 %v449_v62, %v441_v44 }
 0x198   :  { %v451_v63 = vpop.eup %450 }
 0x199   :  { %v143_v1 = vmul.f32 %v451_v63, %v447_v48  ;;  %v142_v3 = vmul.f32 %v451_v63, %v445_v47 }
 0x19b   :  { %v145_v4 = vpack.c.bf16 %v143_v1, %v141_v0  ;;  %v144_v5 = vpack.c.bf16 %v142_v3, %v140_v2 }
 0x19d   :  { %306 = vmatprep.mubr.bf16.mxu0 %v145_v4 }
 0x19e   :  { %307 = vmatmul.mubr.bf16.vlgmr.msra.gmra.mrb[0].mxu0 %v144_v5 }
 0x271   :  { %v393_v6 = vpop.f32.mrb[0].mxu0 }
 0x272   :  { %v394_v7 = vpop.f32.mrb[1].mxu0 }
 0x273   :  { %v395_v8 = vadd.f32 %v394_v7, %v393_v6  ;;  %v396_v9 = vpop.f32.mrb[2].mxu0 }
 0x274   :  { %v397_v10 = vpop.f32.mrb[3].mxu0 }
 0x275   :  { %315 = vst [vmem:[#allocation9] sm:$0xff] %v395_v8  ;;  %v398_v11 = vadd.f32 %v397_v10, %v396_v9 }
 0x277   :  { %316 = vst [vmem:[#allocation9 + $0x8] sm:$0xff] %v398_v11 }
 0x278   :  { %519 = shalt.err (!%p516_p1)
}
 0x279   :  { %s520_s3 = scalar_lea.hbm %s667_s5, 256 }
 0x27a   :  { %p521_p2 = scmp.ne.s32.totalorder %s667_s5, %s520_s3  ;;  %p524_p3 = scmp.lt.u32.totalorder %s520_s3, %s667_s5 }
 0x27c   :  { %p526_p4 = pnand %p524_p3, %p521_p2 }
 0x27e   :  { %529 = shalt.err (!%p526_p4)
}
 0x27f   :  { %s562_s28 = smov 128   ;;  %s563_s29 = smov 8  }
 0x280   :  { %328 = dma.vmem_to_hbm [thread:$0]  %s323_s2, 256, %s667_s5, [#allocation8], %s562_s28, %s562_s28, %s563_s29  }
 0x281   :  { %544 = dma.done.wait [#allocation8], 256  }
 0x282   :  { %545 = vsyncadd [#allocation8], 4294967040 }
 0x283   :  { %332 = vsyncpa [#allocation7], 1 }
 0x284   :  { %333 = vsyncpa [#allocation8], 1 }
 0x285   :  { %334 = vsyncmov [#allocation3] }
 0x288   :  { %s335_s7 = vpop.sfrf %334 }
 0x289   :  { %p376_p5 = scmp.ne.s32.totalorder %s335_s7, 0 }
 0x28b   :  { %339 = shalt.err (%p376_p5)  }

</bundles_post_ra>
